<compile_context>
chip_gen: v7x
topology: tpu7x:2x2x1
jax: 0.10.0
libtpu: 0.0.40
codegen_flags: <defaults>
</compile_context>

<pallas_src>
import functools

import jax
import jax.numpy as jnp
import numpy as np
from jax.experimental import pallas as pl
from jax.experimental.pallas import tpu as pltpu

MXU_DTYPE = jnp.bfloat16   # MXU operand dtype (accumulation stays f32)
OUT_PAD = 128              # fc2 output padded to a full lane width


def _round_up(n, m):
    return ((n + m - 1) // m) * m


# ----------------------------- Pallas kernel -------------------------------
def dqn_kernel(x_ego_ref, x_conv_ref, w1_ref, b1_ref, w2_ref, b2_ref,
               wa_ref, wb_ref, bf1_ref, wf2_ref, bf2_ref, out_ref):
    # conv1: (4,1)-kernel stride-4 -> block-diag matmul, ReLU     (bt, 128)
    xo = x_conv_ref[...].astype(w1_ref.dtype)                      # (bt, 16)
    h1 = jnp.dot(xo, w1_ref[...], preferred_element_type=jnp.float32)
    h1 = jnp.maximum(h1 + b1_ref[...], 0.0)

    # conv2: 1x1 conv -> block-diag matmul, ReLU                  (bt, 128)
    h2 = jnp.dot(h1.astype(w2_ref.dtype), w2_ref[...],
                 preferred_element_type=jnp.float32)
    h2 = jnp.maximum(h2 + b2_ref[...], 0.0)

    # MaxPool over the 4 spatial positions (groups of 32 lanes)   (bt, 32)
    conv_out = jnp.maximum(jnp.maximum(h2[:, 0:32], h2[:, 32:64]),
                           jnp.maximum(h2[:, 64:96], h2[:, 96:128]))

    # fc1 on concat([x_ego, conv_out]):
    #   ego part (K=2) as VPU broadcast-FMAs, conv part (K=32) on the MXU.
    x_ego = x_ego_ref[...]                                         # (bt, 2)
    h_ego = (x_ego[:, 0:1] * wa_ref[0:1, :] +
             x_ego[:, 1:2] * wa_ref[1:2, :])                       # (bt, 256)
    h = (jnp.dot(conv_out.astype(wb_ref.dtype), wb_ref[...],
                 preferred_element_type=jnp.float32)
         + h_ego + bf1_ref[...])
    h = jnp.maximum(h, 0.0)                                        # (bt, 256)

    # fc2 (output padded to 128 lanes -> unmasked lane-dense stores)
    out = jnp.dot(h.astype(wf2_ref.dtype), wf2_ref[...],
                  preferred_element_type=jnp.float32)
    out_ref[...] = out + bf2_ref[...]                              # (bt, 128)


# ------------------------------- wrapper ------------------------------------
@functools.partial(jax.jit, static_argnames=("n_actions", "block_b"))
def dqn_forward(x, params, *, n_actions, block_b=512):
    """x: (B, 18) f32 (flattened (B,1,18,1)).  Returns (B, n_actions) f32."""
    (W1c, b1t, W2c, b2t, Wa, Wb, bf1, Wf2p, bf2p) = params
    B = x.shape[0]

    bt = min(block_b, _round_up(B, 8))       # batch tile (sublane aligned)
    B_pad = _round_up(B, bt)
    grid = (B_pad // bt,)

    x_ego = x[:, 0:2]
    x_conv = x[:, 2:18]
    if B_pad != B:
        pad = B_pad - B
        x_ego = jnp.pad(x_ego, ((0, pad), (0, 0)))
        x_conv = jnp.pad(x_conv, ((0, pad), (0, 0)))

    # Grid-indexed activations; weights use constant index_maps so they are
    # DMA'd once and stay resident in VMEM across all grid steps.
    const = lambda i: (0, 0)
    in_specs = [
        pl.BlockSpec((bt, 2), lambda i: (i, 0)),      # x_ego
        pl.BlockSpec((bt, 16), lambda i: (i, 0)),     # x_conv
        pl.BlockSpec((16, 128), const),               # W1c   (bf16)
        pl.BlockSpec((1, 128), const),                # b1    (f32)
        pl.BlockSpec((128, 128), const),              # W2c   (bf16)
        pl.BlockSpec((1, 128), const),                # b2    (f32)
        pl.BlockSpec((2, 256), const),                # Wa    (f32, VPU path)
        pl.BlockSpec((32, 256), const),               # Wb    (bf16)
        pl.BlockSpec((1, 256), const),                # bf1   (f32)
        pl.BlockSpec((256, OUT_PAD), const),          # Wf2 padded (bf16)
        pl.BlockSpec((1, OUT_PAD), const),            # bf2 padded (f32)
    ]
    out_specs = pl.BlockSpec((bt, OUT_PAD), lambda i: (i, 0))

    flops = 2 * B_pad * (16 * 128 + 128 * 128 + 32 * 256 + 256 * OUT_PAD)
    weight_bytes = sum(int(np.prod(w.shape)) * w.dtype.itemsize
                       for w in (W1c, b1t, W2c, b2t, Wa, Wb, bf1, Wf2p, bf2p))
    bytes_accessed = B_pad * (2 + 16 + OUT_PAD) * 4 + weight_bytes

    out_padded = pl.pallas_call(
        dqn_kernel,
        out_shape=jax.ShapeDtypeStruct((B_pad, OUT_PAD), jnp.float32),
        grid=grid,
        in_specs=in_specs,
        out_specs=out_specs,
        compiler_params=pltpu.CompilerParams(
            dimension_semantics=("parallel",)),
        cost_estimate=pl.CostEstimate(flops=flops, transcendentals=0,
                                      bytes_accessed=bytes_accessed),
    )(x_ego, x_conv, W1c, b1t, W2c, b2t, Wa, Wb, bf1, Wf2p, bf2p)

    return out_padded[:B, :n_actions]


# ------------------------- parameter construction --------------------------
def make_params(key, n_actions):
    ks = jax.random.split(key, 8)
    # PyTorch module shapes
    w1 = jax.random.normal(ks[0], (32, 1, 4, 1), jnp.float32) * 0.1   # Conv2d(1,32,(4,1),4)
    b1 = jax.random.normal(ks[1], (32,), jnp.float32) * 0.1
    w2 = jax.random.normal(ks[2], (32, 32, 1, 1), jnp.float32) * 0.1  # Conv2d(32,32,1,1)
    b2 = jax.random.normal(ks[3], (32,), jnp.float32) * 0.1
    wfc1 = jax.random.normal(ks[4], (256, 34), jnp.float32) * 0.1     # Linear(34,256)
    bfc1 = jax.random.normal(ks[5], (256,), jnp.float32) * 0.1
    wfc2 = jax.random.normal(ks[6], (n_actions, 256), jnp.float32) * 0.1  # Linear(256,n_actions)
    bfc2 = jax.random.normal(ks[7], (n_actions,), jnp.float32) * 0.1

    # Kernel-friendly (matmul) forms
    w1k = w1.reshape(32, 4)                                   # (out_c, k)
    W1c = jax.scipy.linalg.block_diag(*([w1k.T] * 4))         # (16, 128)
    b1t = jnp.tile(b1, 4)[None, :]                            # (1, 128)
    w2m = w2.reshape(32, 32)                                  # (out_c, in_c)
    W2c = jax.scipy.linalg.block_diag(*([w2m.T] * 4))         # (128, 128)
    b2t = jnp.tile(b2, 4)[None, :]                            # (1, 128)
    Wa = wfc1[:, :2].T                                        # (2, 256)  ego (VPU, f32)
    Wb = wfc1[:, 2:].T                                        # (32, 256) conv part
    bf1 = bfc1[None, :]                                       # (1, 256)
    # fc2 padded to 128 output lanes (zero-filled pad columns).
    Wf2p = jnp.zeros((256, OUT_PAD), jnp.float32).at[:, :n_actions].set(wfc2.T)
    bf2p = jnp.zeros((1, OUT_PAD), jnp.float32).at[0, :n_actions].set(bfc2)

    kernel_params = (W1c.astype(MXU_DTYPE), b1t,
                     W2c.astype(MXU_DTYPE), b2t,
                     Wa, Wb.astype(MXU_DTYPE), bf1,
                     Wf2p.astype(MXU_DTYPE), bf2p)
    torch_like_params = (w1k, b1, w2m, b2, wfc1, bfc1, wfc2, bfc2)
    return kernel_params, torch_like_params


# ------------------------ pure-JAX reference (check) ------------------------
def ref_forward(x, torch_like_params):
    w1k, b1, w2m, b2, wfc1, bfc1, wfc2, bfc2 = torch_like_params
    B = x.shape[0]
    x_ego = x[:, :2]
    xo = x[:, 2:].reshape(B, 4, 4)                                   # 4 spatial groups of 4
    h1 = jnp.maximum(jnp.einsum('bhk,ck->bhc', xo, w1k) + b1, 0.0)   # (B,4,32)
    h2 = jnp.maximum(jnp.einsum('bhc,dc->bhd', h1, w2m) + b2, 0.0)   # (B,4,32)
    conv_out = h2.max(axis=1)                                        # MaxPool over (4,1)
    merged = jnp.concatenate([x_ego, conv_out], axis=1)              # (B,34)
    h = jnp.maximum(merged @ wfc1.T + bfc1, 0.0)
    return h @ wfc2.T + bfc2


if __name__ == "__main__":
    n_actions = 8
    key = jax.random.PRNGKey(0)
    kx, kx2, kp = jax.random.split(key, 3)
    kernel_params, torch_like_params = make_params(kp, n_actions)

    # bf16 MXU operands (f32 accumulate) -> compare to f32 ref at loose tol.
    TOL = dict(rtol=2e-2, atol=2e-2)

    # Small test (B=2), single grid step.
    x = jax.random.normal(kx, (2, 18), jnp.float32)       # flattened (B,1,18,1)
    out = jax.block_until_ready(dqn_forward(x, kernel_params, n_actions=n_actions))
    np.testing.assert_allclose(np.asarray(out),
                               np.asarray(ref_forward(x, torch_like_params)), **TOL)

    # Multi-step grid test (B=300, tile=128 -> grid of 3, with batch padding).
    x2 = jax.random.normal(kx2, (300, 18), jnp.float32)
    out2 = jax.block_until_ready(
        dqn_forward(x2, kernel_params, n_actions=n_actions, block_b=128))
    np.testing.assert_allclose(np.asarray(out2),
                               np.asarray(ref_forward(x2, torch_like_params)), **TOL)

    print("KERNEL_OK")
</pallas_src>

<mosaic_0001>
module attributes {stable_mosaic.version = 11 : i64} {
  func.func @dqn_kernel(%arg0: i32, %arg1: memref<8x2xf32, #tpu.memory_space<vmem>>, %arg2: memref<8x16xf32, #tpu.memory_space<vmem>>, %arg3: memref<16x128xbf16, #tpu.memory_space<vmem>>, %arg4: memref<1x128xf32, #tpu.memory_space<vmem>>, %arg5: memref<128x128xbf16, #tpu.memory_space<vmem>>, %arg6: memref<1x128xf32, #tpu.memory_space<vmem>>, %arg7: memref<2x256xf32, #tpu.memory_space<vmem>>, %arg8: memref<32x256xbf16, #tpu.memory_space<vmem>>, %arg9: memref<1x256xf32, #tpu.memory_space<vmem>>, %arg10: memref<256x128xbf16, #tpu.memory_space<vmem>>, %arg11: memref<1x128xf32, #tpu.memory_space<vmem>>, %arg12: memref<8x128xf32, #tpu.memory_space<vmem>>) attributes {dimension_semantics = [#tpu.dimension_semantics<parallel>], iteration_bounds = array<i64: 1>, scalar_prefetch = 0 : i64, scratch_operands = 0 : i64, tpu.core_type = #tpu.core_type<tc>, window_params = [{transform_indices = @transform_0, window_bounds = array<i64: 8, 2>}, {transform_indices = @transform_1, window_bounds = array<i64: 8, 16>}, {pipeline_mode = #tpu.pipeline_mode<synchronous>, transform_indices = @transform_2, window_bounds = array<i64: 16, 128>}, {pipeline_mode = #tpu.pipeline_mode<synchronous>, transform_indices = @transform_3, window_bounds = array<i64: 1, 128>}, {pipeline_mode = #tpu.pipeline_mode<synchronous>, transform_indices = @transform_4, window_bounds = array<i64: 128, 128>}, {pipeline_mode = #tpu.pipeline_mode<synchronous>, transform_indices = @transform_5, window_bounds = array<i64: 1, 128>}, {pipeline_mode = #tpu.pipeline_mode<synchronous>, transform_indices = @transform_6, window_bounds = array<i64: 2, 256>}, {pipeline_mode = #tpu.pipeline_mode<synchronous>, transform_indices = @transform_7, window_bounds = array<i64: 32, 256>}, {pipeline_mode = #tpu.pipeline_mode<synchronous>, transform_indices = @transform_8, window_bounds = array<i64: 1, 256>}, {pipeline_mode = #tpu.pipeline_mode<synchronous>, transform_indices = @transform_9, window_bounds = array<i64: 256, 128>}, {pipeline_mode = #tpu.pipeline_mode<synchronous>, transform_indices = @transform_10, window_bounds = array<i64: 1, 128>}, {transform_indices = @transform_11, window_bounds = array<i64: 8, 128>}]} {
    %c0 = arith.constant 0 : index
    %c0_0 = arith.constant 0 : index
    %0 = vector.load %arg2[%c0, %c0_0] : memref<8x16xf32, #tpu.memory_space<vmem>>, vector<8x16xf32>
    %1 = arith.truncf %0 : vector<8x16xf32> to vector<8x16xbf16>
    %c0_1 = arith.constant 0 : index
    %c0_2 = arith.constant 0 : index
    %2 = vector.load %arg3[%c0_1, %c0_2] : memref<16x128xbf16, #tpu.memory_space<vmem>>, vector<16x128xbf16>
    %cst = arith.constant dense<0.000000e+00> : vector<8x128xf32>
    %3 = tpu.matmul %1, %2, %cst {dimension_numbers = #tpu.dot_dimension_numbers<[1], [0], [0], [1], [0, 0, 1, 1], [], []>} : vector<8x16xbf16>, vector<16x128xbf16>, vector<8x128xf32> -> vector<8x128xf32>
    %c0_3 = arith.constant 0 : index
    %c0_4 = arith.constant 0 : index
    %4 = vector.load %arg4[%c0_3, %c0_4] : memref<1x128xf32, #tpu.memory_space<vmem>>, vector<1x128xf32>
    %5 = vector.broadcast %4 : vector<1x128xf32> to vector<8x128xf32>
    %6 = arith.addf %3, %5 : vector<8x128xf32>
    %cst_5 = arith.constant 0.000000e+00 : f32
    %7 = vector.broadcast %cst_5 : f32 to vector<8x128xf32>
    %8 = arith.maximumf %6, %7 : vector<8x128xf32>
    %9 = arith.truncf %8 : vector<8x128xf32> to vector<8x128xbf16>
    %c0_6 = arith.constant 0 : index
    %c0_7 = arith.constant 0 : index
    %10 = vector.load %arg5[%c0_6, %c0_7] : memref<128x128xbf16, #tpu.memory_space<vmem>>, vector<128x128xbf16>
    %cst_8 = arith.constant dense<0.000000e+00> : vector<8x128xf32>
    %11 = tpu.matmul %9, %10, %cst_8 {dimension_numbers = #tpu.dot_dimension_numbers<[1], [0], [0], [1], [0, 0, 1, 1], [], []>} : vector<8x128xbf16>, vector<128x128xbf16>, vector<8x128xf32> -> vector<8x128xf32>
    %c0_9 = arith.constant 0 : index
    %c0_10 = arith.constant 0 : index
    %12 = vector.load %arg6[%c0_9, %c0_10] : memref<1x128xf32, #tpu.memory_space<vmem>>, vector<1x128xf32>
    %13 = vector.broadcast %12 : vector<1x128xf32> to vector<8x128xf32>
    %14 = arith.addf %11, %13 : vector<8x128xf32>
    %cst_11 = arith.constant 0.000000e+00 : f32
    %15 = vector.broadcast %cst_11 : f32 to vector<8x128xf32>
    %16 = arith.maximumf %14, %15 : vector<8x128xf32>
    %17 = vector.extract_strided_slice %16 {offsets = [0, 0], sizes = [8, 32], strides = [1, 1]} : vector<8x128xf32> to vector<8x32xf32>
    %18 = vector.extract_strided_slice %16 {offsets = [0, 32], sizes = [8, 32], strides = [1, 1]} : vector<8x128xf32> to vector<8x32xf32>
    %19 = arith.maximumf %17, %18 : vector<8x32xf32>
    %20 = vector.extract_strided_slice %16 {offsets = [0, 64], sizes = [8, 32], strides = [1, 1]} : vector<8x128xf32> to vector<8x32xf32>
    %21 = vector.extract_strided_slice %16 {offsets = [0, 96], sizes = [8, 32], strides = [1, 1]} : vector<8x128xf32> to vector<8x32xf32>
    %22 = arith.maximumf %20, %21 : vector<8x32xf32>
    %23 = arith.maximumf %19, %22 : vector<8x32xf32>
    %c0_12 = arith.constant 0 : index
    %c0_13 = arith.constant 0 : index
    %24 = vector.load %arg1[%c0_12, %c0_13] : memref<8x2xf32, #tpu.memory_space<vmem>>, vector<8x2xf32>
    %25 = vector.extract_strided_slice %24 {offsets = [0, 0], sizes = [8, 1], strides = [1, 1]} : vector<8x2xf32> to vector<8x1xf32>
    %c0_14 = arith.constant 0 : index
    %c0_15 = arith.constant 0 : index
    %26 = vector.load %arg7[%c0_14, %c0_15] : memref<2x256xf32, #tpu.memory_space<vmem>>, vector<1x256xf32>
    %27 = vector.broadcast %25 : vector<8x1xf32> to vector<8x256xf32>
    %28 = vector.broadcast %26 : vector<1x256xf32> to vector<8x256xf32>
    %29 = arith.mulf %27, %28 : vector<8x256xf32>
    %30 = vector.extract_strided_slice %24 {offsets = [0, 1], sizes = [8, 1], strides = [1, 1]} : vector<8x2xf32> to vector<8x1xf32>
    %c1 = arith.constant 1 : index
    %c0_16 = arith.constant 0 : index
    %31 = vector.load %arg7[%c1, %c0_16] : memref<2x256xf32, #tpu.memory_space<vmem>>, vector<1x256xf32>
    %32 = vector.broadcast %30 : vector<8x1xf32> to vector<8x256xf32>
    %33 = vector.broadcast %31 : vector<1x256xf32> to vector<8x256xf32>
    %34 = arith.mulf %32, %33 : vector<8x256xf32>
    %35 = arith.addf %29, %34 : vector<8x256xf32>
    %36 = arith.truncf %23 : vector<8x32xf32> to vector<8x32xbf16>
    %c0_17 = arith.constant 0 : index
    %c0_18 = arith.constant 0 : index
    %37 = vector.load %arg8[%c0_17, %c0_18] : memref<32x256xbf16, #tpu.memory_space<vmem>>, vector<32x256xbf16>
    %cst_19 = arith.constant dense<0.000000e+00> : vector<8x256xf32>
    %38 = tpu.matmul %36, %37, %cst_19 {dimension_numbers = #tpu.dot_dimension_numbers<[1], [0], [0], [1], [0, 0, 1, 1], [], []>} : vector<8x32xbf16>, vector<32x256xbf16>, vector<8x256xf32> -> vector<8x256xf32>
    %39 = arith.addf %38, %35 : vector<8x256xf32>
    %c0_20 = arith.constant 0 : index
    %c0_21 = arith.constant 0 : index
    %40 = vector.load %arg9[%c0_20, %c0_21] : memref<1x256xf32, #tpu.memory_space<vmem>>, vector<1x256xf32>
    %41 = vector.broadcast %40 : vector<1x256xf32> to vector<8x256xf32>
    %42 = arith.addf %39, %41 : vector<8x256xf32>
    %cst_22 = arith.constant 0.000000e+00 : f32
    %43 = vector.broadcast %cst_22 : f32 to vector<8x256xf32>
    %44 = arith.maximumf %42, %43 : vector<8x256xf32>
    %45 = arith.truncf %44 : vector<8x256xf32> to vector<8x256xbf16>
    %c0_23 = arith.constant 0 : index
    %c0_24 = arith.constant 0 : index
    %46 = vector.load %arg10[%c0_23, %c0_24] : memref<256x128xbf16, #tpu.memory_space<vmem>>, vector<256x128xbf16>
    %cst_25 = arith.constant dense<0.000000e+00> : vector<8x128xf32>
    %47 = tpu.matmul %45, %46, %cst_25 {dimension_numbers = #tpu.dot_dimension_numbers<[1], [0], [0], [1], [0, 0, 1, 1], [], []>} : vector<8x256xbf16>, vector<256x128xbf16>, vector<8x128xf32> -> vector<8x128xf32>
    %c0_26 = arith.constant 0 : index
    %c0_27 = arith.constant 0 : index
    %48 = vector.load %arg11[%c0_26, %c0_27] : memref<1x128xf32, #tpu.memory_space<vmem>>, vector<1x128xf32>
    %49 = vector.broadcast %48 : vector<1x128xf32> to vector<8x128xf32>
    %50 = arith.addf %47, %49 : vector<8x128xf32>
    %c0_28 = arith.constant 0 : index
    %c0_29 = arith.constant 0 : index
    %51 = vector.load %arg12[%c0_28, %c0_29] : memref<8x128xf32, #tpu.memory_space<vmem>>, vector<8x128xf32>
    tpu.vector_store %arg12[%c0_28, %c0_29], %50 {strides = array<i32>} : memref<8x128xf32, #tpu.memory_space<vmem>>, vector<8x128xf32>,
    return
  }
  func.func @transform_0(%arg0: i32) -> (i32, i32) {
    %c0_i32 = arith.constant 0 : i32
    %c0_i32_0 = arith.constant 0 : i32
    return %arg0, %c0_i32 : i32, i32
  }
  func.func @transform_1(%arg0: i32) -> (i32, i32) {
    %c0_i32 = arith.constant 0 : i32
    %c0_i32_0 = arith.constant 0 : i32
    return %arg0, %c0_i32 : i32, i32
  }
  func.func @transform_2(%arg0: i32) -> (i32, i32) {
    %c0_i32 = arith.constant 0 : i32
    %c0_i32_0 = arith.constant 0 : i32
    %c0_i32_1 = arith.constant 0 : i32
    return %c0_i32, %c0_i32_0 : i32, i32
  }
  func.func @transform_3(%arg0: i32) -> (i32, i32) {
    %c0_i32 = arith.constant 0 : i32
    %c0_i32_0 = arith.constant 0 : i32
    %c0_i32_1 = arith.constant 0 : i32
    return %c0_i32, %c0_i32_0 : i32, i32
  }
  func.func @transform_4(%arg0: i32) -> (i32, i32) {
    %c0_i32 = arith.constant 0 : i32
    %c0_i32_0 = arith.constant 0 : i32
    %c0_i32_1 = arith.constant 0 : i32
    return %c0_i32, %c0_i32_0 : i32, i32
  }
  func.func @transform_5(%arg0: i32) -> (i32, i32) {
    %c0_i32 = arith.constant 0 : i32
    %c0_i32_0 = arith.constant 0 : i32
    %c0_i32_1 = arith.constant 0 : i32
    return %c0_i32, %c0_i32_0 : i32, i32
  }
  func.func @transform_6(%arg0: i32) -> (i32, i32) {
    %c0_i32 = arith.constant 0 : i32
    %c0_i32_0 = arith.constant 0 : i32
    %c0_i32_1 = arith.constant 0 : i32
    return %c0_i32, %c0_i32_0 : i32, i32
  }
  func.func @transform_7(%arg0: i32) -> (i32, i32) {
    %c0_i32 = arith.constant 0 : i32
    %c0_i32_0 = arith.constant 0 : i32
    %c0_i32_1 = arith.constant 0 : i32
    return %c0_i32, %c0_i32_0 : i32, i32
  }
  func.func @transform_8(%arg0: i32) -> (i32, i32) {
    %c0_i32 = arith.constant 0 : i32
    %c0_i32_0 = arith.constant 0 : i32
    %c0_i32_1 = arith.constant 0 : i32
    return %c0_i32, %c0_i32_0 : i32, i32
  }
  func.func @transform_9(%arg0: i32) -> (i32, i32) {
    %c0_i32 = arith.constant 0 : i32
    %c0_i32_0 = arith.constant 0 : i32
    %c0_i32_1 = arith.constant 0 : i32
    return %c0_i32, %c0_i32_0 : i32, i32
  }
  func.func @transform_10(%arg0: i32) -> (i32, i32) {
    %c0_i32 = arith.constant 0 : i32
    %c0_i32_0 = arith.constant 0 : i32
    %c0_i32_1 = arith.constant 0 : i32
    return %c0_i32, %c0_i32_0 : i32, i32
  }
  func.func @transform_11(%arg0: i32) -> (i32, i32) {
    %c0_i32 = arith.constant 0 : i32
    %c0_i32_0 = arith.constant 0 : i32
    return %arg0, %c0_i32 : i32, i32
  }
}

</mosaic_0001>

<bundles_post_ra>
// kernel: dqn_forward.1
= control target key start
LH: loop header
LB: loop body
LE: loop exit
PB: predicated region body
PF: predicated region fallthrough
CT: control target
= control target key end

     0   :  { %16 = vsyncpa [#allocation3], 0  ;;  %s888_s0 = inlined_call_operand.vmem [shape: f32[8,2], index: 0, kind: input, shape index: {}]   ;;  %s889_s1 = inlined_call_operand.vmem [shape: f32[8,16], index: 1, kind: input, shape index: {}]   ;;  %s890_s2 = inlined_call_operand.vmem [shape: bf16[16,128], index: 2, kind: input, shape index: {}]   ;;  %s891_s3 = inlined_call_operand.vmem [shape: f32[1,128], index: 3, kind: input, shape index: {}]   ;;  %s892_s4 = inlined_call_operand.hbm [shape: bf16[128,128], index: 4, kind: input, shape index: {}]   ;;  %s893_s5 = inlined_call_operand.vmem [shape: f32[1,128], index: 5, kind: input, shape index: {}]   ;;  %s894_s6 = inlined_call_operand.vmem [shape: f32[2,256], index: 6, kind: input, shape index: {}]   ;;  %s895_s7 = inlined_call_operand.vmem [shape: bf16[32,256], index: 7, kind: input, shape index: {}]   ;;  %s896_s8 = inlined_call_operand.vmem [shape: f32[1,256], index: 8, kind: input, shape index: {}]   ;;  %s897_s9 = inlined_call_operand.hbm [shape: bf16[256,128], index: 9, kind: input, shape index: {}]   ;;  %s898_s10 = inlined_call_operand.vmem [shape: f32[1,128], index: 10, kind: input, shape index: {}]   ;;  %s899_s11 = inlined_call_operand.vmem [shape: f32[8,128], index: 11, kind: output, shape index: {}]  }
   0x1   :  { %17 = vsyncpa [#allocation5], 0  ;;  %s748_s17 = smov [#allocation2]   ;;  %s700_s21 = scalar_lea.hbm %s892_s4, 1024 }
   0x2   :  { %s31_s18 = sshll.u32 %s748_s17, 4  ;;  %p701_p0 = scmp.ne.s32.totalorder %s892_s4, %s700_s21  ;;  %s32_s18 = int_to_ptr.vmem [resolvable:$true] %s31_s18 }
   0x3   :  { %p704_p1 = scmp.lt.u32.totalorder %s700_s21, %s892_s4 }
   0x5   :  { %p706_p2 = pnand %p704_p1, %p701_p0 }
   0x7   :  { %709 = shalt.err (!%p706_p2)
}
   0x8   :  { %s710_s26 = scalar_lea.vmem %s32_s18, 1024  ;;  %p715_p4 = scmp.lt.s32.totalorder %s32_s18, %s32_s18 }
   0x9   :  { %p711_p3 = scmp.ne.s32.totalorder %s32_s18, %s710_s26  ;;  %p716_p5 = scmp.lt.s32.totalorder %s710_s26, %s710_s26 }
   0xb   :  { %p717_p6 = por %p716_p5, %p715_p4 }
   0xd   :  { %p718_p7 = pnand %p717_p6, %p711_p3 }
   0xf   :  { %721 = shalt.err (!%p718_p7)
}
  0x10   :  { %s749_s27 = smov 64   ;;  %s750_s28 = smov 4  }
  0x11   :  { %37 = dma.hbm_to_vmem [thread:$0]  %s892_s4, 1024, %s32_s18, [#allocation3], %s749_s27, %s749_s27, %s750_s28  }
  0x12   :  { %s751_s12 = smov [#allocation4]   ;;  %s722_s16 = scalar_lea.hbm %s897_s9, 2048 }
  0x13   :  { %s51_s13 = sshll.u32 %s751_s12, 4  ;;  %p723_p8 = scmp.ne.s32.totalorder %s897_s9, %s722_s16  ;;  %s52_s13 = int_to_ptr.vmem [resolvable:$true] %s51_s13 }
  0x14   :  { %p726_p9 = scmp.lt.u32.totalorder %s722_s16, %s897_s9 }
  0x16   :  { %p728_p10 = pnand %p726_p9, %p723_p8 }
  0x18   :  { %731 = shalt.err (!%p728_p10)
}
  0x19   :  { %s732_s22 = scalar_lea.vmem %s52_s13, 2048  ;;  %p737_p12 = scmp.lt.s32.totalorder %s52_s13, %s52_s13 }
  0x1a   :  { %p733_p11 = scmp.ne.s32.totalorder %s52_s13, %s732_s22  ;;  %p738_p13 = scmp.lt.s32.totalorder %s732_s22, %s732_s22 }
  0x1c   :  { %p739_p0 = por %p738_p13, %p737_p12 }
  0x1e   :  { %p740_p1 = pnand %p739_p0, %p733_p11 }
  0x20   :  { %743 = shalt.err (!%p740_p1)
}
  0x21   :  { %57 = dma.hbm_to_vmem [thread:$0]  %s897_s9, 2048, %s52_s13, [#allocation5], %s749_s27, %s749_s27, %s750_s28  }
  0x22   :  { %744 = dma.done.wait [#allocation3], 1024  }
  0x23   :  { %745 = vsyncadd [#allocation3], 4294966272 }
  0x24   :  { %746 = dma.done.wait [#allocation5], 2048  }
  0x25   :  { %747 = vsyncadd [#allocation5], 4294965248  ;;  %v752_v0 = vmov 0.0   ;;  %vm753_vm0 = vmmov 0   ;;  %v669_v1 = vld [vmem:[%s890_s2] sm:$0xff]   ;;  %vm84_vm1 = vcmask 130048   ;;  %v260_v55 = vlaneseq }
  0x26   :  { %631 = vmatprep.subr.bf16.mxu1 %v752_v0  ;;  %633 = vmatprep.mubr.msk.bf16.mxu1 %vm753_vm0, %v752_v0  ;;  %v67_v2 = vld [vmem:[%s889_s1] sm:$0xff]  ;;  %v671_v5 = vld [vmem:[#allocation2 + $0x8] sm:$0xff]   ;;  %v672_v6 = vld [vmem:[#allocation2 + $0x10] sm:$0xff]   ;;  %s754_s13 = smov 96   ;;  %v755_v31 = vmov 0   ;;  %v756_v34 = vmov 1  }
  0x27   :  { %632 = vmatpush3.bf16.msra.mxu1 %v669_v1  ;;  %v68_v3 = vpack.c.bf16 %v67_v2, %v67_v2  ;;  %v670_v4 = vld [vmem:[#allocation2] sm:$0xff]   ;;  %v673_v7 = vld [vmem:[#allocation2 + $0x18] sm:$0xff]   ;;  %v675_v9 = vld [vmem:[#allocation2 + $0x28] sm:$0xff]   ;;  %354 = vmatprep.mubr.bf16.mxu0 %v755_v31  ;;  %vm318_vm2 = vcmask 261120   ;;  %v261_v56 = vshrl.u32 %v260_v55, 7 }
  0x28   :  { %637 = vmatprep.subr.bf16.mxu1 %v752_v0  ;;  %v674_v8 = vld [vmem:[#allocation2 + $0x20] sm:$0xff]   ;;  %v676_v10 = vld [vmem:[#allocation2 + $0x30] sm:$0xff]   ;;  %v677_v11 = vld [vmem:[#allocation2 + $0x38] sm:$0xff]   ;;  %666 = vset.pattern.permute.xlu1 %v755_v31 }
  0x29   :  { %v563_v12 = vld [vmem:[%s891_s3] ss:$0 sm:$0xff]  ;;  %v678_v20 = vld [vmem:[%s895_s7 + $0x4] ss:$8 sps:$4 sm:$0xff]   ;;  %v681_v29 = vld [vmem:[%s895_s7 + $0x14] ss:$8 sps:$4 sm:$0xff]   ;;  %668 = vset.pattern.permute.xlu0 %v756_v34 }
  0x2a   :  { %634 = vmatmul.mubr.msk.bf16.vlgmr.msra.gmra.mrb[0].mxu1 %vm84_vm1, %v68_v3  ;;  %v680_v21 = vld [vmem:[%s895_s7] ss:$8 sps:$4 sm:$0xff]   ;;  %322 = vmatprep.subr.bf16.mxu0 %v678_v20  ;;  %v683_v30 = vld [vmem:[%s895_s7 + $0x10] ss:$8 sps:$4 sm:$0xff]   ;;  %v262_v59 = vsub.s32 0, %v261_v56  ;;  %v266_v60 = vsub.s32 1, %v261_v56 }
  0x2b   :  { %638 = vmatpush3.bf16.msra.mxu1 %v670_v4  ;;  %653 = vmatprep.mubr.msk.bf16.mxu1 %vm753_vm0, %v752_v0  ;;  %v566_v22 = vld [vmem:[%s893_s5] ss:$0 sm:$0xff]  ;;  %v686_v41 = vld [vmem:[#allocation4 + $0x48] sm:$0xff]   ;;  %v688_v43 = vld [vmem:[#allocation4 + $0x50] sm:$0xff]  }
  0x2c   :  { %639 = vmatprep.subr.bf16.mxu1 %v752_v0  ;;  %323 = vmatpush1.bf16.msra.mxu0 %v680_v21  ;;  %v252_v32 = vld [vmem:[%s888_s0] sm:$0xff]  ;;  %v687_v42 = vld [vmem:[#allocation4 + $0x8] sm:$0xff]   ;;  %v689_v44 = vld [vmem:[#allocation4 + $0x10] sm:$0xff]  }
  0x2d   :  { %324 = vmatprep.subr.bf16.mxu0 %v681_v29  ;;  %v684_v33 = vld [vmem:[#allocation4 + $0x40] sm:$0xff]   ;;  %256 = vperm.xlu1 %666, %v252_v32   ;;  %v690_v45 = vld [vmem:[#allocation4 + $0x58] sm:$0xff]   ;;  %v694_v49 = vld [vmem:[#allocation4 + $0x68] sm:$0xff]  }
  0x2e   :  { %v685_v39 = vld [vmem:[#allocation4] sm:$0xff]   ;;  %v691_v46 = vld [vmem:[#allocation4 + $0x18] sm:$0xff]   ;;  %v695_v50 = vld [vmem:[#allocation4 + $0x28] sm:$0xff]  }
  0x2f   :  { %640 = vmatpush3.bf16.msra.mxu1 %v671_v5  ;;  %v692_v47 = vld [vmem:[#allocation4 + $0x60] sm:$0xff]   ;;  %v696_v51 = vld [vmem:[#allocation4 + $0x70] sm:$0xff]   ;;  %v698_v53 = vld [vmem:[#allocation4 + $0x78] sm:$0xff]  }
  0x30   :  { %641 = vmatprep.subr.bf16.mxu1 %v752_v0  ;;  %325 = vmatpush1.bf16.msra.mxu0 %v683_v30  ;;  %v693_v48 = vld [vmem:[#allocation4 + $0x20] sm:$0xff]   ;;  %v697_v52 = vld [vmem:[#allocation4 + $0x30] sm:$0xff]   ;;  %v699_v54 = vld [vmem:[#allocation4 + $0x38] sm:$0xff]  }
  0x31   :  { %609 = vmatprep.subr.bf16.mxu0 %v684_v33  ;;  %667 = vset.pattern.permute.xlu1 %v756_v34  ;;  %v253_v58 = vld [vmem:[%s894_s6] ss:$2 sm:$0x3]  ;;  %v575_v61 = vld [vmem:[%s894_s6 + $0x1] ss:$2 sm:$0x3] }
  0x32   :  { %275 = vperm.xlu1 %667, %v252_v32   ;;  %v263_v62 = vrot.slane %v253_v58, %v262_v59  ;;  %v282_v63 = vrot.slane %v575_v61, %v262_v59  ;;  %v286_v1 = vrot.slane %v575_v61, %v266_v60 }
  0x33   :  { %642 = vmatpush3.bf16.msra.mxu1 %v672_v6 }
  0x34   :  { %643 = vmatprep.subr.bf16.mxu1 %v752_v0 }
  0x37   :  { %644 = vmatpush3.bf16.msra.mxu1 %v673_v7  ;;  %v363_v7 = vld [vmem:[%s896_s8] sm:$0x3] }
  0x38   :  { %645 = vmatprep.subr.bf16.mxu1 %v752_v0 }
  0x3b   :  { %646 = vmatpush3.bf16.msra.mxu1 %v674_v8 }
  0x3c   :  { %647 = vmatprep.subr.bf16.mxu1 %v752_v0 }
  0x3f   :  { %648 = vmatpush3.bf16.msra.mxu1 %v675_v9  ;;  %v368_v9 = vrot.slane %v363_v7, %v262_v59 }
  0x40   :  { %649 = vmatprep.subr.bf16.mxu1 %v752_v0 }
  0x43   :  { %650 = vmatpush3.bf16.msra.mxu1 %v676_v10 }
  0x44   :  { %651 = vmatprep.subr.bf16.mxu1 %v752_v0  ;;  %v267_v0 = vrot.slane %v253_v58, %v266_v60 }
  0x47   :  { %652 = vmatpush3.bf16.msra.mxu1 %v677_v11 }
  0xac   :  { %v257_v57 = vpop.permute.xlu1 %256 }
  0xad   :  { %v270_v3 = vmul.f32 %v263_v62, %v257_v57  ;;  %v271_v5 = vmul.f32 %v267_v0, %v257_v57 }
  0xb1   :  { %v276_v2 = vpop.permute.xlu1 %275 }
  0xb2   :  { %v289_v4 = vmul.f32 %v282_v63, %v276_v2  ;;  %v290_v6 = vmul.f32 %v286_v1, %v276_v2 }
  0xb4   :  { %v291_v8 = vadd.f32 %v289_v4, %v270_v3  ;;  %v292_v11 = vadd.f32 %v290_v6, %v271_v5 }
  0xfd   :  { %v122_v13 = vpop.f32.mrb[0].mxu1 }
  0xfe   :  { %v123_v14 = vadd.f32 %v563_v12, %v122_v13  ;;  %v635_v15 = vpop.f32.mrb[1].mxu1  ;;  %v372_v12 = vrot.slane %v363_v7, %v266_v60 }
  0xff   :  { %v125_v16 = vpop.f32.mrb[2].mxu1 }
 0x100   :  { %v128_v17 = vmax.f32 %v123_v14, 0.0  ;;  %v636_v18 = vpop.f32.mrb[3].mxu1 }
 0x102   :  { %v129_v19 = vpack.c.bf16 %v128_v17, %v128_v17 }
 0x104   :  { %654 = vmatmul.mubr.bf16.vlgmr.msra.gmra.mrb[4].mxu1 %v129_v19 }
 0x1d7   :  { %v235_v23 = vpop.f32.mrb[4].mxu1 }
 0x1d8   :  { %v236_v24 = vadd.f32 %v566_v22, %v235_v23  ;;  %v655_v25 = vpop.f32.mrb[5].mxu1 }
 0x1d9   :  { %v238_v26 = vpop.f32.mrb[6].mxu1  ;;  %v581_v25 = vld [vmem:[%s898_s10] ss:$0 sm:$0xff] }
 0x1da   :  { %v241_v27 = vmax.f32 %v236_v24, 0.0  ;;  %v656_v28 = vpop.f32.mrb[7].mxu1 }
 0x1dc   :  { %243 = vrot.lane.b32.xlu0 %v241_v27, %s754_s13 }
 0x24e   :  { %v244_v35 = vpop.permute.xlu0 %243 }
 0x24f   :  { %v246_v36 = vmax.f32 %v241_v27, %v244_v35 }
 0x251   :  { %248 = vrot.lane.b32.xlu0 %v246_v36, %s749_s27 }
 0x2c3   :  { %v249_v37 = vpop.permute.xlu0 %248 }
 0x2c4   :  { %v251_v38 = vmax.f32 %v246_v36, %v249_v37 }
 0x2c6   :  { %v293_v40 = vpack.c.bf16 %v251_v38, %v251_v38 }
 0x2c8   :  { %580 = vmatmul.mubr.msk.bf16.vlgmr.msra.gmra.mrb[0].mxu0 %vm318_vm2, %v293_v40 }
 0x2c9   :  { %610 = vmatpush3.bf16.msra.mxu0 %v685_v39 }
 0x2ca   :  { %611 = vmatprep.subr.bf16.mxu0 %v686_v41 }
 0x2cd   :  { %612 = vmatpush3.bf16.msra.mxu0 %v687_v42 }
 0x2ce   :  { %613 = vmatprep.subr.bf16.mxu0 %v688_v43 }
 0x2d1   :  { %614 = vmatpush3.bf16.msra.mxu0 %v689_v44 }
 0x2d2   :  { %615 = vmatprep.subr.bf16.mxu0 %v690_v45 }
 0x2d5   :  { %616 = vmatpush3.bf16.msra.mxu0 %v691_v46 }
 0x2d6   :  { %617 = vmatprep.subr.bf16.mxu0 %v692_v47 }
 0x2d9   :  { %618 = vmatpush3.bf16.msra.mxu0 %v693_v48 }
 0x2da   :  { %619 = vmatprep.subr.bf16.mxu0 %v694_v49 }
 0x2dd   :  { %620 = vmatpush3.bf16.msra.mxu0 %v695_v50 }
 0x2de   :  { %621 = vmatprep.subr.bf16.mxu0 %v696_v51 }
 0x2e1   :  { %622 = vmatpush3.bf16.msra.mxu0 %v697_v52 }
 0x2e2   :  { %623 = vmatprep.subr.bf16.mxu0 %v698_v53 }
 0x2e5   :  { %624 = vmatpush3.bf16.msra.mxu0 %v699_v54 }
 0x39b   :  { %v356_v10 = vpop.f32.mrb[0].mxu0 }
 0x39c   :  { %v357_v13 = vadd.f32 %v356_v10, %v291_v8  ;;  %v358_v14 = vpop.f32.mrb[1].mxu0 }
 0x39d   :  { %v359_v15 = vadd.f32 %v358_v14, %v292_v11  ;;  %v360_v16 = vpop.f32.mrb[2].mxu0 }
 0x39e   :  { %v375_v17 = vadd.f32 %v368_v9, %v357_v13  ;;  %v361_v18 = vpop.f32.mrb[3].mxu0 }
 0x39f   :  { %v376_v19 = vadd.f32 %v372_v12, %v359_v15 }
 0x3a0   :  { %v377_v20 = vmax.f32 %v375_v17, 0.0 }
 0x3a1   :  { %v378_v21 = vmax.f32 %v376_v19, 0.0 }
 0x3a2   :  { %v379_v23 = vpack.c.bf16 %v377_v20, %v377_v20 }
 0x3a3   :  { %v380_v22 = vpack.c.bf16 %v378_v21, %v378_v21 }
 0x3a5   :  { %548 = vmatprep.mubr.bf16.mxu0 %v380_v22 }
 0x3a6   :  { %549 = vmatmul.mubr.bf16.vlgmr.msra.gmra.mrb[4].mxu0 %v379_v23 }
 0x479   :  { %v625_v24 = vpop.f32.mrb[4].mxu0 }
 0x47a   :  { %v626_v26 = vpop.f32.mrb[5].mxu0 }
 0x47b   :  { %v627_v27 = vadd.f32 %v626_v26, %v625_v24  ;;  %v628_v28 = vpop.f32.mrb[6].mxu0 }
 0x47c   :  { %v629_v29 = vpop.f32.mrb[7].mxu0 }
 0x47d   :  { %v551_v30 = vadd.f32 %v627_v27, %v581_v25 }
 0x47f   :  { %556 = vst [vmem:[%s899_s11] sm:$0xff] %v551_v30 }
 0x480   :  { %561 = vsyncpa [#allocation3], 1 }
 0x481   :  { %562 = vsyncpa [#allocation5], 1 }

</bundles_post_ra>
